<compile_context>
chip_gen: v5e
topology: v5e:2x2
jax: 0.10.0
libtpu: 0.0.40
codegen_flags: <defaults>
</compile_context>

<pallas_src>
import jax
import jax.numpy as jnp
import numpy as np
from jax import lax
from jax.experimental import pallas as pl
from jax.experimental.pallas import tpu as pltpu


# ----------------------------- mish variants ------------------------------

def _softplus(x):
    # numerically stable softplus (matches F.softplus) -- reference only
    return jnp.maximum(x, 0.0) + jnp.log1p(jnp.exp(-jnp.abs(x)))


def _mish_ref(x):
    return x * jnp.tanh(_softplus(x))


def _mish_fast(x):
    # mish(x) = x * tanh(softplus(x)) = x * t(t+2) / (t(t+2) + 2), t = exp(x).
    # One EUP transcendental (exp) + one divide instead of exp + log1p + tanh.
    # Clamp the exponent so t*(t+2) never overflows; for x > 20 the ratio is 1
    # to well below float32 precision.  Differs from the reference only in
    # low-order float32 bits.
    t = jnp.exp(jnp.minimum(x, 20.0))
    p = t * (t + 2.0)
    return x * (p / (p + 2.0))


# ------------------------------- kernel ------------------------------------

def _shift_fwd(a):
    # column l of the result holds a[:, l-1]; column 0 is zero  (tap k=0)
    z = jnp.zeros((a.shape[0], 1), a.dtype)
    return jnp.concatenate([z, a[:, :-1]], axis=1)


def _shift_bwd(a):
    # column l of the result holds a[:, l+1]; last column is zero  (tap k=2)
    z = jnp.zeros((a.shape[0], 1), a.dtype)
    return jnp.concatenate([a[:, 1:], z], axis=1)


def _conv3(x, w_ref, b):
    # x: (C_in_like, L); w_ref: (3, C_out_like, C_in_like) tap-major;
    # b: (C_out_like, 1).  Returns (C_out_like, L) in float32.
    acc = jnp.dot(w_ref[0], _shift_fwd(x), preferred_element_type=jnp.float32)
    acc = acc + jnp.dot(w_ref[1], x, preferred_element_type=jnp.float32)
    acc = acc + jnp.dot(w_ref[2], _shift_bwd(x), preferred_element_type=jnp.float32)
    return acc + b


def _resblock_kernel(x_ref, w1_ref, b1_ref, w2_ref, b2_ref, out_ref):
    # x_ref:   (NB, Cin, L)   native NCL block (channels on sublanes, L on lanes)
    # w1_ref:  (3, Cmid, Cin) conv_1 weight, tap-major
    # b1_ref:  (Cmid, 1)
    # w2_ref:  (3, Cin, Cmid) conv_2 weight, tap-major
    # b2_ref:  (Cin, 1)
    # out_ref: (NB, Cin, L)
    b1 = b1_ref[...].astype(jnp.float32)
    b2 = b2_ref[...].astype(jnp.float32)

    # Static unroll over the batches folded into this grid step; weights stay
    # resident, each conv tap is a (Cout,Cin) @ (Cin,L) MXU matmul.
    for n in range(x_ref.shape[0]):
        x = x_ref[n].astype(jnp.float32)          # (Cin, L)
        h = _mish_fast(_conv3(x, w1_ref, b1))     # (Cmid, L), stays in vregs
        y = _conv3(h, w2_ref, b2) + x             # residual from the same block
        out_ref[n] = _mish_fast(y).astype(out_ref.dtype)


# ------------------------------- wrapper ------------------------------------

def resblock_forward(x_ncl, w1_oik, b1, w2_oik, b2, *, batch_block=None):
    """x_ncl: (N, Cin, L); weights in PyTorch Conv1d layout (O, I, K=3)."""
    N, Cin, L = x_ncl.shape
    Cmid, _, K = w1_oik.shape
    assert K == 3 and w2_oik.shape == (Cin, Cmid, 3)

    if batch_block is None:
        batch_block = 1
        for cand in range(min(N, 8), 0, -1):
            if N % cand == 0:
                batch_block = cand
                break
    assert N % batch_block == 0

    # Tap-major weights: (3, Cout, Cin) so each tap multiplies directly from
    # the left onto the (Cin, L) block.  These are tiny one-time reshapes.
    w1_t = jnp.transpose(w1_oik, (2, 0, 1))       # (3, Cmid, Cin)
    w2_t = jnp.transpose(w2_oik, (2, 0, 1))       # (3, Cin, Cmid)
    b1_2d = b1.reshape(Cmid, 1)
    b2_2d = b2.reshape(Cin, 1)

    grid = (N // batch_block,)
    return pl.pallas_call(
        _resblock_kernel,
        out_shape=jax.ShapeDtypeStruct((N, Cin, L), x_ncl.dtype),
        grid_spec=pltpu.PrefetchScalarGridSpec(
            num_scalar_prefetch=0,
            grid=grid,
            in_specs=[
                pl.BlockSpec((batch_block, Cin, L), lambda n: (n, 0, 0)),
                pl.BlockSpec((3, Cmid, Cin), lambda n: (0, 0, 0)),
                pl.BlockSpec((Cmid, 1), lambda n: (0, 0)),
                pl.BlockSpec((3, Cin, Cmid), lambda n: (0, 0, 0)),
                pl.BlockSpec((Cin, 1), lambda n: (0, 0)),
            ],
            out_specs=pl.BlockSpec((batch_block, Cin, L), lambda n: (n, 0, 0)),
        ),
        compiler_params=pltpu.CompilerParams(
            dimension_semantics=("parallel",),
            vmem_limit_bytes=32 * 1024 * 1024,
        ),
    )(x_ncl, w1_t, b1_2d, w2_t, b2_2d)


# ------------------------------ reference -----------------------------------

def resblock_reference(x_ncl, w1_oik, b1, w2_oik, b2):
    """Pure-JAX reference with lax.conv, matching PyTorch Conv1d semantics."""
    dn = ("NCH", "OIH", "NCH")
    h = lax.conv_general_dilated(x_ncl, w1_oik, window_strides=(1,),
                                 padding=[(1, 1)], dimension_numbers=dn)
    h = h + b1[None, :, None]
    h = _mish_ref(h)
    y = lax.conv_general_dilated(h, w2_oik, window_strides=(1,),
                                 padding=[(1, 1)], dimension_numbers=dn)
    y = y + b2[None, :, None]
    y = y + x_ncl
    return _mish_ref(y)


# --------------------------------- main --------------------------------------

if __name__ == "__main__":
    # Small shapes consistent with ResBlock(in_channel=4, channel=16)
    N, Cin, Cmid, L = 2, 4, 16, 16

    key = jax.random.PRNGKey(0)
    k_x, k_w1, k_b1, k_w2, k_b2 = jax.random.split(key, 5)

    x = jax.random.normal(k_x, (N, Cin, L), dtype=jnp.float32)

    # Deterministic parameter init (PyTorch Conv1d weight layout: (O, I, K))
    fan1 = Cin * 3
    fan2 = Cmid * 3
    w1 = jax.random.uniform(k_w1, (Cmid, Cin, 3), jnp.float32,
                            -1.0 / np.sqrt(fan1), 1.0 / np.sqrt(fan1))
    b1 = jax.random.uniform(k_b1, (Cmid,), jnp.float32,
                            -1.0 / np.sqrt(fan1), 1.0 / np.sqrt(fan1))
    w2 = jax.random.uniform(k_w2, (Cin, Cmid, 3), jnp.float32,
                            -1.0 / np.sqrt(fan2), 1.0 / np.sqrt(fan2))
    b2 = jax.random.uniform(k_b2, (Cin,), jnp.float32,
                            -1.0 / np.sqrt(fan2), 1.0 / np.sqrt(fan2))

    out = resblock_forward(x, w1, b1, w2, b2)
    out = jax.block_until_ready(out)

    ref = jax.block_until_ready(resblock_reference(x, w1, b1, w2, b2))
    # Tolerance slightly above 1e-5: the single-exp algebraic mish differs from
    # tanh(softplus(x)) only in low-order float32 bits.
    np.testing.assert_allclose(np.asarray(out), np.asarray(ref),
                               rtol=2e-5, atol=2e-5)

    print("KERNEL_OK")
</pallas_src>

<mosaic_0001>
module attributes {stable_mosaic.version = 11 : i64} {
  func.func @_resblock_kernel(%arg0: i32, %arg1: memref<2x4x16xf32, #tpu.memory_space<vmem>>, %arg2: memref<3x16x4xf32, #tpu.memory_space<vmem>>, %arg3: memref<16x1xf32, #tpu.memory_space<vmem>>, %arg4: memref<3x4x16xf32, #tpu.memory_space<vmem>>, %arg5: memref<4x1xf32, #tpu.memory_space<vmem>>, %arg6: memref<2x4x16xf32, #tpu.memory_space<vmem>>) attributes {dimension_semantics = [#tpu.dimension_semantics<parallel>], iteration_bounds = array<i64: 1>, scalar_prefetch = 0 : i64, scratch_operands = 0 : i64, tpu.core_type = #tpu.core_type<tc>, window_params = [{transform_indices = @transform_0, window_bounds = array<i64: 2, 4, 16>}, {pipeline_mode = #tpu.pipeline_mode<synchronous>, transform_indices = @transform_1, window_bounds = array<i64: 3, 16, 4>}, {pipeline_mode = #tpu.pipeline_mode<synchronous>, transform_indices = @transform_2, window_bounds = array<i64: 16, 1>}, {pipeline_mode = #tpu.pipeline_mode<synchronous>, transform_indices = @transform_3, window_bounds = array<i64: 3, 4, 16>}, {pipeline_mode = #tpu.pipeline_mode<synchronous>, transform_indices = @transform_4, window_bounds = array<i64: 4, 1>}, {transform_indices = @transform_5, window_bounds = array<i64: 2, 4, 16>}]} {
    %c0 = arith.constant 0 : index
    %c0_0 = arith.constant 0 : index
    %0 = vector.load %arg3[%c0, %c0_0] : memref<16x1xf32, #tpu.memory_space<vmem>>, vector<16x1xf32>
    %c0_1 = arith.constant 0 : index
    %c0_2 = arith.constant 0 : index
    %1 = vector.load %arg5[%c0_1, %c0_2] : memref<4x1xf32, #tpu.memory_space<vmem>>, vector<4x1xf32>
    %c0_3 = arith.constant 0 : index
    %c0_4 = arith.constant 0 : index
    %c0_5 = arith.constant 0 : index
    %2 = vector.load %arg1[%c0_3, %c0_4, %c0_5] : memref<2x4x16xf32, #tpu.memory_space<vmem>>, vector<1x4x16xf32>
    %3 = vector.shape_cast %2 : vector<1x4x16xf32> to vector<4x16xf32>
    %c0_6 = arith.constant 0 : index
    %c0_7 = arith.constant 0 : index
    %c0_8 = arith.constant 0 : index
    %4 = vector.load %arg2[%c0_6, %c0_7, %c0_8] : memref<3x16x4xf32, #tpu.memory_space<vmem>>, vector<1x16x4xf32>
    %5 = vector.shape_cast %4 : vector<1x16x4xf32> to vector<16x4xf32>
    %cst = arith.constant 0.000000e+00 : f32
    %6 = vector.broadcast %cst : f32 to vector<4x1xf32>
    %7 = vector.extract_strided_slice %3 {offsets = [0, 0], sizes = [4, 15], strides = [1, 1]} : vector<4x16xf32> to vector<4x15xf32>
    %8 = tpu.concatenate %6, %7 in 1 : vector<4x1xf32>, vector<4x15xf32> -> vector<4x16xf32>
    %cst_9 = arith.constant dense<0.000000e+00> : vector<16x16xf32>
    %9 = tpu.matmul %5, %8, %cst_9 {dimension_numbers = #tpu.dot_dimension_numbers<[1], [0], [0], [1], [0, 0, 1, 1], [], []>} : vector<16x4xf32>, vector<4x16xf32>, vector<16x16xf32> -> vector<16x16xf32>
    %c1 = arith.constant 1 : index
    %c0_10 = arith.constant 0 : index
    %c0_11 = arith.constant 0 : index
    %10 = vector.load %arg2[%c1, %c0_10, %c0_11] : memref<3x16x4xf32, #tpu.memory_space<vmem>>, vector<1x16x4xf32>
    %11 = vector.shape_cast %10 : vector<1x16x4xf32> to vector<16x4xf32>
    %cst_12 = arith.constant dense<0.000000e+00> : vector<16x16xf32>
    %12 = tpu.matmul %11, %3, %cst_12 {dimension_numbers = #tpu.dot_dimension_numbers<[1], [0], [0], [1], [0, 0, 1, 1], [], []>} : vector<16x4xf32>, vector<4x16xf32>, vector<16x16xf32> -> vector<16x16xf32>
    %13 = arith.addf %9, %12 : vector<16x16xf32>
    %c2 = arith.constant 2 : index
    %c0_13 = arith.constant 0 : index
    %c0_14 = arith.constant 0 : index
    %14 = vector.load %arg2[%c2, %c0_13, %c0_14] : memref<3x16x4xf32, #tpu.memory_space<vmem>>, vector<1x16x4xf32>
    %15 = vector.shape_cast %14 : vector<1x16x4xf32> to vector<16x4xf32>
    %cst_15 = arith.constant 0.000000e+00 : f32
    %16 = vector.broadcast %cst_15 : f32 to vector<4x1xf32>
    %17 = vector.extract_strided_slice %3 {offsets = [0, 1], sizes = [4, 15], strides = [1, 1]} : vector<4x16xf32> to vector<4x15xf32>
    %18 = tpu.concatenate %17, %16 in 1 : vector<4x15xf32>, vector<4x1xf32> -> vector<4x16xf32>
    %cst_16 = arith.constant dense<0.000000e+00> : vector<16x16xf32>
    %19 = tpu.matmul %15, %18, %cst_16 {dimension_numbers = #tpu.dot_dimension_numbers<[1], [0], [0], [1], [0, 0, 1, 1], [], []>} : vector<16x4xf32>, vector<4x16xf32>, vector<16x16xf32> -> vector<16x16xf32>
    %20 = arith.addf %13, %19 : vector<16x16xf32>
    %21 = vector.broadcast %0 : vector<16x1xf32> to vector<16x16xf32>
    %22 = arith.addf %20, %21 : vector<16x16xf32>
    %cst_17 = arith.constant 2.000000e+01 : f32
    %23 = vector.broadcast %cst_17 : f32 to vector<16x16xf32>
    %24 = arith.minimumf %22, %23 : vector<16x16xf32>
    %25 = math.exp %24 : vector<16x16xf32>
    %cst_18 = arith.constant 2.000000e+00 : f32
    %26 = vector.broadcast %cst_18 : f32 to vector<16x16xf32>
    %27 = arith.addf %25, %26 : vector<16x16xf32>
    %28 = arith.mulf %25, %27 : vector<16x16xf32>
    %cst_19 = arith.constant 2.000000e+00 : f32
    %29 = vector.broadcast %cst_19 : f32 to vector<16x16xf32>
    %30 = arith.addf %28, %29 : vector<16x16xf32>
    %31 = arith.divf %28, %30 : vector<16x16xf32>
    %32 = arith.mulf %22, %31 : vector<16x16xf32>
    %c0_20 = arith.constant 0 : index
    %c0_21 = arith.constant 0 : index
    %c0_22 = arith.constant 0 : index
    %33 = vector.load %arg4[%c0_20, %c0_21, %c0_22] : memref<3x4x16xf32, #tpu.memory_space<vmem>>, vector<1x4x16xf32>
    %34 = vector.shape_cast %33 : vector<1x4x16xf32> to vector<4x16xf32>
    %cst_23 = arith.constant 0.000000e+00 : f32
    %35 = vector.broadcast %cst_23 : f32 to vector<16x1xf32>
    %36 = vector.extract_strided_slice %32 {offsets = [0, 0], sizes = [16, 15], strides = [1, 1]} : vector<16x16xf32> to vector<16x15xf32>
    %37 = tpu.concatenate %35, %36 in 1 : vector<16x1xf32>, vector<16x15xf32> -> vector<16x16xf32>
    %cst_24 = arith.constant dense<0.000000e+00> : vector<4x16xf32>
    %38 = tpu.matmul %34, %37, %cst_24 {dimension_numbers = #tpu.dot_dimension_numbers<[1], [0], [0], [1], [0, 0, 1, 1], [], []>} : vector<4x16xf32>, vector<16x16xf32>, vector<4x16xf32> -> vector<4x16xf32>
    %c1_25 = arith.constant 1 : index
    %c0_26 = arith.constant 0 : index
    %c0_27 = arith.constant 0 : index
    %39 = vector.load %arg4[%c1_25, %c0_26, %c0_27] : memref<3x4x16xf32, #tpu.memory_space<vmem>>, vector<1x4x16xf32>
    %40 = vector.shape_cast %39 : vector<1x4x16xf32> to vector<4x16xf32>
    %cst_28 = arith.constant dense<0.000000e+00> : vector<4x16xf32>
    %41 = tpu.matmul %40, %32, %cst_28 {dimension_numbers = #tpu.dot_dimension_numbers<[1], [0], [0], [1], [0, 0, 1, 1], [], []>} : vector<4x16xf32>, vector<16x16xf32>, vector<4x16xf32> -> vector<4x16xf32>
    %42 = arith.addf %38, %41 : vector<4x16xf32>
    %c2_29 = arith.constant 2 : index
    %c0_30 = arith.constant 0 : index
    %c0_31 = arith.constant 0 : index
    %43 = vector.load %arg4[%c2_29, %c0_30, %c0_31] : memref<3x4x16xf32, #tpu.memory_space<vmem>>, vector<1x4x16xf32>
    %44 = vector.shape_cast %43 : vector<1x4x16xf32> to vector<4x16xf32>
    %cst_32 = arith.constant 0.000000e+00 : f32
    %45 = vector.broadcast %cst_32 : f32 to vector<16x1xf32>
    %46 = vector.extract_strided_slice %32 {offsets = [0, 1], sizes = [16, 15], strides = [1, 1]} : vector<16x16xf32> to vector<16x15xf32>
    %47 = tpu.concatenate %46, %45 in 1 : vector<16x15xf32>, vector<16x1xf32> -> vector<16x16xf32>
    %cst_33 = arith.constant dense<0.000000e+00> : vector<4x16xf32>
    %48 = tpu.matmul %44, %47, %cst_33 {dimension_numbers = #tpu.dot_dimension_numbers<[1], [0], [0], [1], [0, 0, 1, 1], [], []>} : vector<4x16xf32>, vector<16x16xf32>, vector<4x16xf32> -> vector<4x16xf32>
    %49 = arith.addf %42, %48 : vector<4x16xf32>
    %50 = vector.broadcast %1 : vector<4x1xf32> to vector<4x16xf32>
    %51 = arith.addf %49, %50 : vector<4x16xf32>
    %52 = arith.addf %51, %3 : vector<4x16xf32>
    %cst_34 = arith.constant 2.000000e+01 : f32
    %53 = vector.broadcast %cst_34 : f32 to vector<4x16xf32>
    %54 = arith.minimumf %52, %53 : vector<4x16xf32>
    %55 = math.exp %54 : vector<4x16xf32>
    %cst_35 = arith.constant 2.000000e+00 : f32
    %56 = vector.broadcast %cst_35 : f32 to vector<4x16xf32>
    %57 = arith.addf %55, %56 : vector<4x16xf32>
    %58 = arith.mulf %55, %57 : vector<4x16xf32>
    %cst_36 = arith.constant 2.000000e+00 : f32
    %59 = vector.broadcast %cst_36 : f32 to vector<4x16xf32>
    %60 = arith.addf %58, %59 : vector<4x16xf32>
    %61 = arith.divf %58, %60 : vector<4x16xf32>
    %62 = arith.mulf %52, %61 : vector<4x16xf32>
    %c0_37 = arith.constant 0 : index
    %c0_38 = arith.constant 0 : index
    %c0_39 = arith.constant 0 : index
    %63 = vector.load %arg6[%c0_37, %c0_38, %c0_39] : memref<2x4x16xf32, #tpu.memory_space<vmem>>, vector<1x4x16xf32>
    %64 = vector.shape_cast %63 : vector<1x4x16xf32> to vector<4x16xf32>
    %65 = vector.shape_cast %62 : vector<4x16xf32> to vector<1x4x16xf32>
    tpu.vector_store %arg6[%c0_37, %c0_38, %c0_39], %65 {strides = array<i32>} : memref<2x4x16xf32, #tpu.memory_space<vmem>>, vector<1x4x16xf32>,
    %c1_40 = arith.constant 1 : index
    %c0_41 = arith.constant 0 : index
    %c0_42 = arith.constant 0 : index
    %66 = vector.load %arg1[%c1_40, %c0_41, %c0_42] : memref<2x4x16xf32, #tpu.memory_space<vmem>>, vector<1x4x16xf32>
    %67 = vector.shape_cast %66 : vector<1x4x16xf32> to vector<4x16xf32>
    %c0_43 = arith.constant 0 : index
    %c0_44 = arith.constant 0 : index
    %c0_45 = arith.constant 0 : index
    %68 = vector.load %arg2[%c0_43, %c0_44, %c0_45] : memref<3x16x4xf32, #tpu.memory_space<vmem>>, vector<1x16x4xf32>
    %69 = vector.shape_cast %68 : vector<1x16x4xf32> to vector<16x4xf32>
    %cst_46 = arith.constant 0.000000e+00 : f32
    %70 = vector.broadcast %cst_46 : f32 to vector<4x1xf32>
    %71 = vector.extract_strided_slice %67 {offsets = [0, 0], sizes = [4, 15], strides = [1, 1]} : vector<4x16xf32> to vector<4x15xf32>
    %72 = tpu.concatenate %70, %71 in 1 : vector<4x1xf32>, vector<4x15xf32> -> vector<4x16xf32>
    %cst_47 = arith.constant dense<0.000000e+00> : vector<16x16xf32>
    %73 = tpu.matmul %69, %72, %cst_47 {dimension_numbers = #tpu.dot_dimension_numbers<[1], [0], [0], [1], [0, 0, 1, 1], [], []>} : vector<16x4xf32>, vector<4x16xf32>, vector<16x16xf32> -> vector<16x16xf32>
    %c1_48 = arith.constant 1 : index
    %c0_49 = arith.constant 0 : index
    %c0_50 = arith.constant 0 : index
    %74 = vector.load %arg2[%c1_48, %c0_49, %c0_50] : memref<3x16x4xf32, #tpu.memory_space<vmem>>, vector<1x16x4xf32>
    %75 = vector.shape_cast %74 : vector<1x16x4xf32> to vector<16x4xf32>
    %cst_51 = arith.constant dense<0.000000e+00> : vector<16x16xf32>
    %76 = tpu.matmul %75, %67, %cst_51 {dimension_numbers = #tpu.dot_dimension_numbers<[1], [0], [0], [1], [0, 0, 1, 1], [], []>} : vector<16x4xf32>, vector<4x16xf32>, vector<16x16xf32> -> vector<16x16xf32>
    %77 = arith.addf %73, %76 : vector<16x16xf32>
    %c2_52 = arith.constant 2 : index
    %c0_53 = arith.constant 0 : index
    %c0_54 = arith.constant 0 : index
    %78 = vector.load %arg2[%c2_52, %c0_53, %c0_54] : memref<3x16x4xf32, #tpu.memory_space<vmem>>, vector<1x16x4xf32>
    %79 = vector.shape_cast %78 : vector<1x16x4xf32> to vector<16x4xf32>
    %cst_55 = arith.constant 0.000000e+00 : f32
    %80 = vector.broadcast %cst_55 : f32 to vector<4x1xf32>
    %81 = vector.extract_strided_slice %67 {offsets = [0, 1], sizes = [4, 15], strides = [1, 1]} : vector<4x16xf32> to vector<4x15xf32>
    %82 = tpu.concatenate %81, %80 in 1 : vector<4x15xf32>, vector<4x1xf32> -> vector<4x16xf32>
    %cst_56 = arith.constant dense<0.000000e+00> : vector<16x16xf32>
    %83 = tpu.matmul %79, %82, %cst_56 {dimension_numbers = #tpu.dot_dimension_numbers<[1], [0], [0], [1], [0, 0, 1, 1], [], []>} : vector<16x4xf32>, vector<4x16xf32>, vector<16x16xf32> -> vector<16x16xf32>
    %84 = arith.addf %77, %83 : vector<16x16xf32>
    %85 = vector.broadcast %0 : vector<16x1xf32> to vector<16x16xf32>
    %86 = arith.addf %84, %85 : vector<16x16xf32>
    %cst_57 = arith.constant 2.000000e+01 : f32
    %87 = vector.broadcast %cst_57 : f32 to vector<16x16xf32>
    %88 = arith.minimumf %86, %87 : vector<16x16xf32>
    %89 = math.exp %88 : vector<16x16xf32>
    %cst_58 = arith.constant 2.000000e+00 : f32
    %90 = vector.broadcast %cst_58 : f32 to vector<16x16xf32>
    %91 = arith.addf %89, %90 : vector<16x16xf32>
    %92 = arith.mulf %89, %91 : vector<16x16xf32>
    %cst_59 = arith.constant 2.000000e+00 : f32
    %93 = vector.broadcast %cst_59 : f32 to vector<16x16xf32>
    %94 = arith.addf %92, %93 : vector<16x16xf32>
    %95 = arith.divf %92, %94 : vector<16x16xf32>
    %96 = arith.mulf %86, %95 : vector<16x16xf32>
    %c0_60 = arith.constant 0 : index
    %c0_61 = arith.constant 0 : index
    %c0_62 = arith.constant 0 : index
    %97 = vector.load %arg4[%c0_60, %c0_61, %c0_62] : memref<3x4x16xf32, #tpu.memory_space<vmem>>, vector<1x4x16xf32>
    %98 = vector.shape_cast %97 : vector<1x4x16xf32> to vector<4x16xf32>
    %cst_63 = arith.constant 0.000000e+00 : f32
    %99 = vector.broadcast %cst_63 : f32 to vector<16x1xf32>
    %100 = vector.extract_strided_slice %96 {offsets = [0, 0], sizes = [16, 15], strides = [1, 1]} : vector<16x16xf32> to vector<16x15xf32>
    %101 = tpu.concatenate %99, %100 in 1 : vector<16x1xf32>, vector<16x15xf32> -> vector<16x16xf32>
    %cst_64 = arith.constant dense<0.000000e+00> : vector<4x16xf32>
    %102 = tpu.matmul %98, %101, %cst_64 {dimension_numbers = #tpu.dot_dimension_numbers<[1], [0], [0], [1], [0, 0, 1, 1], [], []>} : vector<4x16xf32>, vector<16x16xf32>, vector<4x16xf32> -> vector<4x16xf32>
    %c1_65 = arith.constant 1 : index
    %c0_66 = arith.constant 0 : index
    %c0_67 = arith.constant 0 : index
    %103 = vector.load %arg4[%c1_65, %c0_66, %c0_67] : memref<3x4x16xf32, #tpu.memory_space<vmem>>, vector<1x4x16xf32>
    %104 = vector.shape_cast %103 : vector<1x4x16xf32> to vector<4x16xf32>
    %cst_68 = arith.constant dense<0.000000e+00> : vector<4x16xf32>
    %105 = tpu.matmul %104, %96, %cst_68 {dimension_numbers = #tpu.dot_dimension_numbers<[1], [0], [0], [1], [0, 0, 1, 1], [], []>} : vector<4x16xf32>, vector<16x16xf32>, vector<4x16xf32> -> vector<4x16xf32>
    %106 = arith.addf %102, %105 : vector<4x16xf32>
    %c2_69 = arith.constant 2 : index
    %c0_70 = arith.constant 0 : index
    %c0_71 = arith.constant 0 : index
    %107 = vector.load %arg4[%c2_69, %c0_70, %c0_71] : memref<3x4x16xf32, #tpu.memory_space<vmem>>, vector<1x4x16xf32>
    %108 = vector.shape_cast %107 : vector<1x4x16xf32> to vector<4x16xf32>
    %cst_72 = arith.constant 0.000000e+00 : f32
    %109 = vector.broadcast %cst_72 : f32 to vector<16x1xf32>
    %110 = vector.extract_strided_slice %96 {offsets = [0, 1], sizes = [16, 15], strides = [1, 1]} : vector<16x16xf32> to vector<16x15xf32>
    %111 = tpu.concatenate %110, %109 in 1 : vector<16x15xf32>, vector<16x1xf32> -> vector<16x16xf32>
    %cst_73 = arith.constant dense<0.000000e+00> : vector<4x16xf32>
    %112 = tpu.matmul %108, %111, %cst_73 {dimension_numbers = #tpu.dot_dimension_numbers<[1], [0], [0], [1], [0, 0, 1, 1], [], []>} : vector<4x16xf32>, vector<16x16xf32>, vector<4x16xf32> -> vector<4x16xf32>
    %113 = arith.addf %106, %112 : vector<4x16xf32>
    %114 = vector.broadcast %1 : vector<4x1xf32> to vector<4x16xf32>
    %115 = arith.addf %113, %114 : vector<4x16xf32>
    %116 = arith.addf %115, %67 : vector<4x16xf32>
    %cst_74 = arith.constant 2.000000e+01 : f32
    %117 = vector.broadcast %cst_74 : f32 to vector<4x16xf32>
    %118 = arith.minimumf %116, %117 : vector<4x16xf32>
    %119 = math.exp %118 : vector<4x16xf32>
    %cst_75 = arith.constant 2.000000e+00 : f32
    %120 = vector.broadcast %cst_75 : f32 to vector<4x16xf32>
    %121 = arith.addf %119, %120 : vector<4x16xf32>
    %122 = arith.mulf %119, %121 : vector<4x16xf32>
    %cst_76 = arith.constant 2.000000e+00 : f32
    %123 = vector.broadcast %cst_76 : f32 to vector<4x16xf32>
    %124 = arith.addf %122, %123 : vector<4x16xf32>
    %125 = arith.divf %122, %124 : vector<4x16xf32>
    %126 = arith.mulf %116, %125 : vector<4x16xf32>
    %c1_77 = arith.constant 1 : index
    %c0_78 = arith.constant 0 : index
    %c0_79 = arith.constant 0 : index
    %127 = vector.load %arg6[%c1_77, %c0_78, %c0_79] : memref<2x4x16xf32, #tpu.memory_space<vmem>>, vector<1x4x16xf32>
    %128 = vector.shape_cast %127 : vector<1x4x16xf32> to vector<4x16xf32>
    %129 = vector.shape_cast %126 : vector<4x16xf32> to vector<1x4x16xf32>
    tpu.vector_store %arg6[%c1_77, %c0_78, %c0_79], %129 {strides = array<i32>} : memref<2x4x16xf32, #tpu.memory_space<vmem>>, vector<1x4x16xf32>,
    return
  }
  func.func @transform_0(%arg0: i32) -> (i32, i32, i32) {
    %c0_i32 = arith.constant 0 : i32
    %c0_i32_0 = arith.constant 0 : i32
    %c0_i32_1 = arith.constant 0 : i32
    return %arg0, %c0_i32, %c0_i32_0 : i32, i32, i32
  }
  func.func @transform_1(%arg0: i32) -> (i32, i32, i32) {
    %c0_i32 = arith.constant 0 : i32
    %c0_i32_0 = arith.constant 0 : i32
    %c0_i32_1 = arith.constant 0 : i32
    %c0_i32_2 = arith.constant 0 : i32
    return %c0_i32, %c0_i32_0, %c0_i32_1 : i32, i32, i32
  }
  func.func @transform_2(%arg0: i32) -> (i32, i32) {
    %c0_i32 = arith.constant 0 : i32
    %c0_i32_0 = arith.constant 0 : i32
    %c0_i32_1 = arith.constant 0 : i32
    return %c0_i32, %c0_i32_0 : i32, i32
  }
  func.func @transform_3(%arg0: i32) -> (i32, i32, i32) {
    %c0_i32 = arith.constant 0 : i32
    %c0_i32_0 = arith.constant 0 : i32
    %c0_i32_1 = arith.constant 0 : i32
    %c0_i32_2 = arith.constant 0 : i32
    return %c0_i32, %c0_i32_0, %c0_i32_1 : i32, i32, i32
  }
  func.func @transform_4(%arg0: i32) -> (i32, i32) {
    %c0_i32 = arith.constant 0 : i32
    %c0_i32_0 = arith.constant 0 : i32
    %c0_i32_1 = arith.constant 0 : i32
    return %c0_i32, %c0_i32_0 : i32, i32
  }
  func.func @transform_5(%arg0: i32) -> (i32, i32, i32) {
    %c0_i32 = arith.constant 0 : i32
    %c0_i32_0 = arith.constant 0 : i32
    %c0_i32_1 = arith.constant 0 : i32
    return %arg0, %c0_i32, %c0_i32_0 : i32, i32, i32
  }
}

</mosaic_0001>

<bundles_post_ra>
// kernel: tpu_custom_call.1
= control target key start
LH: loop header
LB: loop body
LE: loop exit
PB: predicated region body
PF: predicated region fallthrough
CT: control target
= control target key end

     0   :  { %s915_s0 = inlined_call_operand.vmem [shape: f32[2,4,16], index: 0, kind: input, shape index: {}]   ;;  %s916_s1 = inlined_call_operand.vmem [shape: f32[3,16,4], index: 1, kind: input, shape index: {}]   ;;  %s917_s2 = inlined_call_operand.vmem [shape: f32[16,1], index: 2, kind: input, shape index: {}]   ;;  %s918_s3 = inlined_call_operand.vmem [shape: f32[3,4,16], index: 3, kind: input, shape index: {}]   ;;  %s919_s4 = inlined_call_operand.vmem [shape: f32[4,1], index: 4, kind: input, shape index: {}]   ;;  %s920_s5 = inlined_call_operand.hbm [shape: f32[2,4,16], index: 5, kind: output, shape index: {}]  }
   0x1   :  { %v766_v0 = vld [vmem:[%s915_s0] sm:$0xf] }
   0x2   :  { %10 = vsyncpa [#allocation3], 0  ;;  %s727_s20 = smov 127   ;;  %s728_s21 = smov 1   ;;  %vm43_vm0 = vcmask 1043456   ;;  %vm36_vm1 = vcmask 31744  }
   0x3   :  { %104 = vrot.lane.b32.xlu0 %v766_v0, %s727_s20  ;;  %621 = vmatpush.msk.msra.mxu0 %vm43_vm0, %v766_v0  ;;  %v619_v1 = vld [vmem:[%s916_s1 + $0x10] sm:$0xff]  ;;  %v22_v2 = vld [vmem:[%s917_s2 + $0x8] sm:$0xff]  ;;  %v729_v3 = vmov 0   ;;  %v620_v4 = vld [vmem:[%s916_s1 + $0x18] sm:$0xff]  ;;  %vm107_vm2 = vcmask 121856   ;;  %vm31_vm3 = vcmask 7168  }
   0x4   :  { %622 = vmatmul.msk.f32.vlgmr.msra.gmra.mxu0 %vm36_vm1, %v619_v1  ;;  %674 = vset.pattern.permute.xlu1 %v729_v3  ;;  %v21_v5 = vld [vmem:[%s917_s2] sm:$0xff]  ;;  %v805_v11 = vld [vmem:[%s916_s1 + $0x28] sm:$0xff]  ;;  %vm212_vm12 = vcmask 130048   ;;  %vm854_vm13 = vmneg %vm31_vm3  ;;  %s607_s28 = sshll.u32 %s920_s5, 4  ;;  %s731_s29 = smov 64   ;;  %s608_s28 = int_to_ptr.hbm [resolvable:$true] %s607_s28 }
   0x5   :  { %675 = vset.pattern.permute.xlu2 %v729_v3  ;;  %150 = vperm.xlu1 %674, %v22_v2   ;;  %v791_v7 = vld [vmem:[%s916_s1 + $0x20] sm:$0xff]  ;;  %v816_v13 = vld [vmem:[%s916_s1 + $0x8] sm:$0xff]  ;;  %s732_s30 = smov 4  }
   0x6   :  { %676 = vset.pattern.permute.xlu0 %v729_v3  ;;  %v800_v10 = vld [vmem:[%s916_s1] sm:$0xff] }
   0x7   :  { %v827_v21 = vld [vmem:[%s915_s0 + $0x4] sm:$0xf] }
   0x8   :  { %v632_v2 = vld [vmem:[%s918_s3 + $0x4] sm:$0xf] }
   0xb   :  { %28 = vrot.lane.b32.xlu0 %v766_v0, %s728_s21 }
   0xc   :  { %623 = vmatmul.msk.f32.gmra.mxu0 %vm36_vm1, %v620_v4 }
   0xd   :  { %145 = vperm.xlu1 %674, %v21_v5  }
  0x13   :  { %329 = vrot.lane.b32.xlu0 %v827_v21, %s728_s21 }
  0x15   :  { %400 = vrot.lane.b32.xlu1 %v827_v21, %s727_s20 }
  0x75   :  { %v105_v6 = vpop.permute.xlu0 %104 }
  0x76   :  { %v108_v8 = vsel %vm107_vm2, %v105_v6, 0.0 }
  0x77   :  { %629 = vmatpush.msk.msra.mxu2 %vm43_vm0, %v108_v8  ;;  %v820_v14 = vpop.permute.xlu1 %150 }
  0x78   :  { %630 = vmatmul.msk.f32.vlgmr.msra.gmra.mxu2 %vm36_vm1, %v791_v7 }
  0x7d   :  { %v29_v9 = vpop.permute.xlu0 %28 }
  0x7e   :  { %v32_v12 = vsel %vm31_vm3, 0.0, %v29_v9  ;;  %v199_v9 = vld [vmem:[%s918_s3] sm:$0xf] }
  0x7f   :  { %624 = vmatpush.msk.msra.mxu1 %vm43_vm0, %v32_v12  ;;  %v822_v19 = vpop.permute.xlu1 %145 }
  0x80   :  { %625 = vmatmul.msk.f32.vlgmr.msra.gmra.mxu1 %vm36_vm1, %v800_v10  ;;  %631 = vmatmul.msk.f32.gmra.mxu2 %vm36_vm1, %v805_v11 }
  0x81   :  { %v63_v15 = vpop.f32.mrf.mxu0  ;;  %646 = vmatpush.msk.msrb.mxu1 %vm43_vm0, %v827_v21 }
  0x85   :  { %v330_v3 = vpop.permute.xlu0 %329 }
  0x87   :  { %v401_v8 = vpop.permute.xlu1 %400 }
  0x88   :  { %626 = vmatmul.msk.f32.gmra.mxu1 %vm36_vm1, %v816_v13 }
  0x89   :  { %v66_v23 = vpop.f32.mrf.mxu0 }
  0x90   :  { %647 = vmatmul.msk.f32.vlgmr.msrb.gmra.mxu1 %vm36_vm1, %v619_v1 }
  0x98   :  { %648 = vmatmul.msk.f32.gmra.mxu1 %vm36_vm1, %v620_v4  ;;  %v332_v4 = vsel %vm31_vm3, 0.0, %v330_v3 }
  0x99   :  { %649 = vmatpush.msk.msrb.mxu2 %vm43_vm0, %v332_v4  ;;  %v657_v4 = vld [vmem:[%s918_s3 + $0x4] sm:$0xf] }
  0x9a   :  { %650 = vmatmul.msk.f32.vlgmr.msrb.gmra.mxu2 %vm36_vm1, %v800_v10  ;;  %v403_v10 = vsel %vm107_vm2, %v401_v8, 0.0 }
  0xa2   :  { %651 = vmatmul.msk.f32.gmra.mxu2 %vm36_vm1, %v816_v13 }
  0xfb   :  { %v135_v16 = vpop.f32.mrf.mxu2 }
  0xfd   :  { %v95_v17 = vpop.f32.mrf.mxu1 }
  0xfe   :  { %v96_v18 = vadd.f32 %v95_v17, %v63_v15  ;;  %v639_v15 = vld [vmem:[%s918_s3 + $0x8] sm:$0xf] }
 0x100   :  { %v141_v20 = vadd.f32 %v135_v16, %v96_v18 }
 0x102   :  { %v153_v22 = vadd.f32 %v822_v19, %v141_v20 }
 0x103   :  { %v138_v26 = vpop.f32.mrf.mxu2 }
 0x104   :  { %v155_v24 = vmin.f32 %v153_v22, 20.0 }
 0x105   :  { %v98_v25 = vpop.f32.mrf.mxu1 }
 0x106   :  { %v157_v27 = vmul.f32 1.442695, %v155_v24  ;;  %v99_v28 = vadd.f32 %v98_v25, %v66_v23 }
 0x108   :  { %677 = vpow2.f32 %v157_v27  ;;  %v142_v29 = vadd.f32 %v138_v26, %v99_v28 }
 0x10a   :  { %v154_v30 = vadd.f32 %v820_v14, %v142_v29 }
 0x10c   :  { %v156_v31 = vmin.f32 %v154_v30, 20.0 }
 0x10d   :  { %v360_v18 = vpop.f32.mrf.mxu1 }
 0x10e   :  { %v678_v32 = vpop.eup %677  ;;  %v159_v33 = vmul.f32 1.442695, %v156_v31 }
 0x10f   :  { %v161_v34 = vadd.f32 2.0, %v678_v32 }
 0x110   :  { %679 = vpow2.f32 %v159_v33 }
 0x111   :  { %v163_v35 = vmul.f32 %v678_v32, %v161_v34 }
 0x113   :  { %v165_v36 = vadd.f32 2.0, %v163_v35 }
 0x115   :  { %681 = vrcp.f32 %v165_v36  ;;  %v178_v44 = vand.u32 2147483648, %v165_v36  ;;  %v176_v46 = vand.u32 2147483647, %v165_v36  ;;  %vm172_vm5 = vweird.f32 %v165_v36  ;;  %v363_v27 = vpop.f32.mrf.mxu1 }
 0x116   :  { %v680_v37 = vpop.eup %679 }
 0x117   :  { %v162_v38 = vadd.f32 2.0, %v680_v37  ;;  %v179_v49 = vor.u32 1.1754944e-38, %v178_v44  ;;  %vm177_vm7 = vcmp.eq.f32.partialorder %v176_v46, 8.507059e+37 }
 0x119   :  { %v164_v39 = vmul.f32 %v680_v37, %v162_v38 }
 0x11b   :  { %v682_v40 = vpop.eup %681  ;;  %v166_v41 = vadd.f32 2.0, %v164_v39 }
 0x11c   :  { %v168_v42 = vmul.f32 %v682_v40, %v165_v36  ;;  %vm173_vm4 = vweird.f32 %v682_v40 }
 0x11d   :  { %683 = vrcp.f32 %v166_v41  ;;  %vm174_vm6 = vmor %vm172_vm5, %vm173_vm4  ;;  %v193_v55 = vand.u32 2147483648, %v166_v41  ;;  %v191_v58 = vand.u32 2147483647, %v166_v41  ;;  %vm187_vm9 = vweird.f32 %v166_v41 }
 0x11e   :  { %v169_v43 = vsub.f32 1.0, %v168_v42 }
 0x11f   :  { %v194_v60 = vor.u32 1.1754944e-38, %v193_v55  ;;  %vm192_vm11 = vcmp.eq.f32.partialorder %v191_v58, 8.507059e+37 }
 0x120   :  { %v170_v45 = vmul.f32 %v682_v40, %v169_v43 }
 0x122   :  { %v171_v47 = vadd.f32 %v682_v40, %v170_v45 }
 0x123   :  { %v684_v48 = vpop.eup %683 }
 0x124   :  { %v175_v50 = vsel %vm174_vm6, %v682_v40, %v171_v47  ;;  %v183_v51 = vmul.f32 %v684_v48, %v166_v41  ;;  %vm188_vm8 = vweird.f32 %v684_v48 }
 0x125   :  { %v180_v52 = vsel %vm177_vm7, %v179_v49, %v175_v50  ;;  %vm189_vm10 = vmor %vm187_vm9, %vm188_vm8 }
 0x126   :  { %v181_v53 = vmul.f32 %v180_v52, %v163_v35  ;;  %v184_v54 = vsub.f32 1.0, %v183_v51 }
 0x128   :  { %v197_v56 = vmul.f32 %v181_v53, %v153_v22  ;;  %v185_v57 = vmul.f32 %v684_v48, %v184_v54  ;;  %v392_v22 = vpop.f32.mrf.mxu2 }
 0x129   :  { %v393_v24 = vadd.f32 %v392_v22, %v360_v18 }
 0x12a   :  { %261 = vrot.lane.b32.xlu0 %v197_v56, %s727_s20  ;;  %v186_v59 = vadd.f32 %v684_v48, %v185_v57 }
 0x12c   :  { %v190_v61 = vsel %vm189_vm10, %v684_v48, %v186_v59 }
 0x12d   :  { %v195_v62 = vsel %vm192_vm11, %v194_v60, %v190_v61  ;;  %vm322_vm11 = vcmask 125952  }
 0x12e   :  { %v196_v63 = vmul.f32 %v195_v62, %v164_v39 }
 0x130   :  { %v198_v1 = vmul.f32 %v196_v63, %v154_v30  ;;  %v395_v28 = vpop.f32.mrf.mxu2 }
 0x131   :  { %v396_v30 = vadd.f32 %v395_v28, %v363_v27 }
 0x132   :  { %204 = vrot.lane.b32.xlu2 %v198_v1, %s728_s21  ;;  %230 = vmatpush.msra.mxu3 %v198_v1 }
 0x134   :  { %231 = vmatpush.msra.mxu3 %v197_v56 }
 0x135   :  { %633 = vmatmul.msk.f32.vlgmr.msra.gmra.mxu3 %vm212_vm12, %v632_v2  ;;  %v23_v2 = vld [vmem:[%s919_s4] sm:$0xf] }
 0x13a   :  { %202 = vrot.lane.b32.xlu2 %v197_v56, %s728_s21 }
 0x142   :  { %263 = vrot.lane.b32.xlu2 %v198_v1, %s727_s20 }
 0x18c   :  { %v205_v6 = vpop.permute.xlu2 %204 }
 0x18d   :  { %635 = vmatpush.msk.msrb.mxu3 %vm854_vm13, %v205_v6 }
 0x194   :  { %v203_v12 = vpop.permute.xlu2 %202 }
 0x195   :  { %637 = vmatpush.msk.msrb.mxu3 %vm854_vm13, %v203_v12 }
 0x196   :  { %638 = vmatmul.msk.f32.vlgmr.msrb.gmra.mxu3 %vm212_vm12, %v199_v9 }
 0x197   :  { %654 = vmatpush.msk.msra.mxu3 %vm43_vm0, %v403_v10 }
 0x19c   :  { %v264_v13 = vpop.permute.xlu2 %263  ;;  %v262_v16 = vpop.permute.xlu0 %261 }
 0x19d   :  { %640 = vmatpush.msk.msrb.mxu0 %vm107_vm2, %v264_v13 }
 0x19e   :  { %655 = vmatmul.msk.f32.vlgmr.msra.gmra.mxu3 %vm36_vm1, %v791_v7 }
 0x19f   :  { %641 = vmatpush.msk.msrb.mxu0 %vm107_vm2, %v262_v16 }
 0x1a0   :  { %642 = vmatmul.msk.f32.vlgmr.msrb.gmra.mxu0 %vm212_vm12, %v639_v15 }
 0x1a6   :  { %656 = vmatmul.msk.f32.gmra.mxu3 %vm36_vm1, %v805_v11 }
 0x1b8   :  { %v233_v17 = vpop.f32.mrf.mxu3 }
 0x219   :  { %v256_v20 = vpop.f32.mrf.mxu3 }
 0x21a   :  { %v878_v23 = vadd.f32 %v256_v20, %v233_v17 }
 0x21d   :  { %v289_v8 = vpop.f32.mrf.mxu0 }
 0x21e   :  { %v292_v9 = vadd.f32 %v289_v8, %v878_v23  ;;  %v484_v23 = vld [vmem:[%s918_s3] sm:$0xf] }
 0x221   :  { %v430_v25 = vpop.f32.mrf.mxu3 }
 0x222   :  { %v436_v26 = vadd.f32 %v430_v25, %v393_v24 }
 0x224   :  { %v438_v7 = vadd.f32 %v436_v26, %v822_v19 }
 0x226   :  { %v440_v29 = vmin.f32 %v438_v7, 20.0 }
 0x228   :  { %v442_v31 = vmul.f32 1.442695, %v440_v29 }
 0x229   :  { %v433_v32 = vpop.f32.mrf.mxu3 }
 0x22a   :  { %685 = vpow2.f32 %v442_v31  ;;  %v437_v33 = vadd.f32 %v433_v32, %v396_v30 }
 0x22c   :  { %v439_v11 = vadd.f32 %v437_v33, %v820_v14 }
 0x22e   :  { %v441_v34 = vmin.f32 %v439_v11, 20.0 }
 0x230   :  { %v686_v35 = vpop.eup %685  ;;  %v444_v36 = vmul.f32 1.442695, %v441_v34 }
 0x231   :  { %v446_v37 = vadd.f32 2.0, %v686_v35 }
 0x232   :  { %687 = vpow2.f32 %v444_v36 }
 0x233   :  { %v448_v38 = vmul.f32 %v686_v35, %v446_v37 }
 0x235   :  { %v450_v39 = vadd.f32 2.0, %v448_v38 }
 0x237   :  { %689 = vrcp.f32 %v450_v39  ;;  %v463_v46 = vand.u32 2147483648, %v450_v39  ;;  %v461_v14 = vand.u32 2147483647, %v450_v39  ;;  %vm457_vm15 = vweird.f32 %v450_v39 }
 0x238   :  { %v688_v40 = vpop.eup %687 }
 0x239   :  { %v447_v41 = vadd.f32 2.0, %v688_v40  ;;  %v464_v50 = vor.u32 1.1754944e-38, %v463_v46  ;;  %vm462_vm1 = vcmp.eq.f32.partialorder %v461_v14, 8.507059e+37 }
 0x23b   :  { %v449_v42 = vmul.f32 %v688_v40, %v447_v41 }
 0x23d   :  { %v690_v19 = vpop.eup %689  ;;  %v451_v43 = vadd.f32 2.0, %v449_v42 }
 0x23e   :  { %v453_v44 = vmul.f32 %v690_v19, %v450_v39  ;;  %vm458_vm14 = vweird.f32 %v690_v19 }
 0x23f   :  { %691 = vrcp.f32 %v451_v43  ;;  %vm459_vm0 = vmor %vm457_vm15, %vm458_vm14  ;;  %v478_v56 = vand.u32 2147483648, %v451_v43  ;;  %v476_v59 = vand.u32 2147483647, %v451_v43  ;;  %vm472_vm4 = vweird.f32 %v451_v43 }
 0x240   :  { %v454_v45 = vsub.f32 1.0, %v453_v44 }
 0x241   :  { %v479_v61 = vor.u32 1.1754944e-38, %v478_v56  ;;  %vm477_vm6 = vcmp.eq.f32.partialorder %v476_v59, 8.507059e+37 }
 0x242   :  { %v455_v47 = vmul.f32 %v690_v19, %v454_v45 }
 0x244   :  { %v456_v48 = vadd.f32 %v690_v19, %v455_v47 }
 0x245   :  { %v692_v49 = vpop.eup %691 }
 0x246   :  { %v460_v51 = vsel %vm459_vm0, %v690_v19, %v456_v48  ;;  %v468_v52 = vmul.f32 %v692_v49, %v451_v43  ;;  %vm473_vm3 = vweird.f32 %v692_v49 }
 0x247   :  { %v465_v53 = vsel %vm462_vm1, %v464_v50, %v460_v51  ;;  %vm474_vm5 = vmor %vm472_vm4, %vm473_vm3 }
 0x248   :  { %v466_v54 = vmul.f32 %v465_v53, %v448_v38  ;;  %v469_v55 = vsub.f32 1.0, %v468_v52 }
 0x24a   :  { %v482_v57 = vmul.f32 %v466_v54, %v438_v7  ;;  %v470_v58 = vmul.f32 %v692_v49, %v469_v55  ;;  %v664_v7 = vld [vmem:[%s918_s3 + $0x8] sm:$0xf]  ;;  %s730_s3 = smov [#allocation2]  }
 0x24b   :  { %s605_s25 = sshll.u32 %s730_s3, 4  ;;  %s606_s25 = int_to_ptr.vmem [resolvable:$true] %s605_s25 }
 0x24c   :  { %487 = vrot.lane.b32.xlu2 %v482_v57, %s728_s21  ;;  %v471_v60 = vadd.f32 %v692_v49, %v470_v58 }
 0x24e   :  { %v475_v62 = vsel %vm474_vm5, %v692_v49, %v471_v60 }
 0x24f   :  { %v480_v63 = vsel %vm477_vm6, %v479_v61, %v475_v62 }
 0x250   :  { %v481_v1 = vmul.f32 %v480_v63, %v449_v42 }
 0x252   :  { %v483_v3 = vmul.f32 %v481_v1, %v439_v11 }
 0x254   :  { %295 = vperm.xlu2 %675, %v23_v2   ;;  %545 = vrot.lane.b32.xlu0 %v483_v3, %s727_s20 }
 0x255   :  { %489 = vrot.lane.b32.xlu1 %v483_v3, %s728_s21  ;;  %513 = vmatpush.msra.mxu0 %v483_v3 }
 0x257   :  { %514 = vmatpush.msra.mxu0 %v482_v57 }
 0x258   :  { %658 = vmatmul.msk.f32.vlgmr.msra.gmra.mxu0 %vm212_vm12, %v657_v4 }
 0x25d   :  { %543 = vrot.lane.b32.xlu1 %v482_v57, %s727_s20 }
 0x2a6   :  { %v488_v6 = vpop.permute.xlu2 %487 }
 0x2ae   :  { %v296_v12 = vpop.permute.xlu2 %295 }
 0x2af   :  { %v298_v10 = vadd.f32 %v296_v12, %v292_v9 }
 0x2b1   :  { %v299_v13 = vadd.f32 %v298_v10, %v766_v0 }
 0x2b3   :  { %v300_v15 = vmin.f32 %v299_v13, 20.0 }
 0x2b5   :  { %v301_v16 = vmul.f32 1.442695, %v300_v15 }
 0x2b7   :  { %693 = vpow2.f32 %v301_v16 }
 0x2bd   :  { %v694_v17 = vpop.eup %693 }
 0x2be   :  { %v303_v18 = vadd.f32 2.0, %v694_v17 }
 0x2c0   :  { %v304_v20 = vmul.f32 %v694_v17, %v303_v18 }
 0x2c2   :  { %v305_v22 = vadd.f32 2.0, %v304_v20 }
 0x2c4   :  { %695 = vrcp.f32 %v305_v22  ;;  %v317_v28 = vand.u32 2147483648, %v305_v22  ;;  %v315_v30 = vand.u32 2147483647, %v305_v22  ;;  %vm311_vm8 = vweird.f32 %v305_v22 }
 0x2c6   :  { %v546_v24 = vpop.permute.xlu0 %545  ;;  %v318_v5 = vor.u32 1.1754944e-38, %v317_v28  ;;  %vm316_vm10 = vcmp.eq.f32.partialorder %v315_v30, 8.507059e+37 }
 0x2c7   :  { %v490_v25 = vpop.permute.xlu1 %489  ;;  %665 = vmatpush.msk.msra.mxu1 %vm107_vm2, %v546_v24 }
 0x2c8   :  { %660 = vmatpush.msk.msrb.mxu0 %vm854_vm13, %v490_v25 }
 0x2ca   :  { %v696_v0 = vpop.eup %695  ;;  %662 = vmatpush.msk.msrb.mxu0 %vm854_vm13, %v488_v6 }
 0x2cb   :  { %v307_v26 = vmul.f32 %v696_v0, %v305_v22  ;;  %663 = vmatmul.msk.f32.vlgmr.msrb.gmra.mxu0 %vm212_vm12, %v484_v23  ;;  %vm312_vm7 = vweird.f32 %v696_v0 }
 0x2cc   :  { %vm313_vm9 = vmor %vm311_vm8, %vm312_vm7 }
 0x2cd   :  { %v308_v27 = vsub.f32 1.0, %v307_v26 }
 0x2cf   :  { %v309_v29 = vmul.f32 %v696_v0, %v308_v27  ;;  %v544_v31 = vpop.permute.xlu1 %543 }
 0x2d0   :  { %666 = vmatpush.msk.msra.mxu1 %vm107_vm2, %v544_v31 }
 0x2d1   :  { %v310_v32 = vadd.f32 %v696_v0, %v309_v29  ;;  %667 = vmatmul.msk.f32.vlgmr.msra.gmra.mxu1 %vm212_vm12, %v664_v7 }
 0x2d3   :  { %v314_v33 = vsel %vm313_vm9, %v696_v0, %v310_v32 }
 0x2d4   :  { %v319_v11 = vsel %vm316_vm10, %v318_v5, %v314_v33 }
 0x2d5   :  { %v320_v34 = vmul.f32 %v319_v11, %v304_v20  ;;  %v516_v36 = vpop.f32.mrf.mxu0 }
 0x2d7   :  { %v321_v35 = vmul.f32 %v320_v34, %v299_v13 }
 0x2d9   :  { %323 = vst.msk [vmem:[#allocation2] sm:$0xf] %vm322_vm11, %v321_v35 }
 0x348   :  { %v539_v37 = vpop.f32.mrf.mxu0 }
 0x349   :  { %v540_v38 = vadd.f32 %v539_v37, %v516_v36 }
 0x34e   :  { %v571_v39 = vpop.f32.mrf.mxu1 }
 0x34f   :  { %v574_v40 = vadd.f32 %v571_v39, %v540_v38 }
 0x351   :  { %v575_v41 = vadd.f32 %v574_v40, %v296_v12 }
 0x353   :  { %v576_v42 = vadd.f32 %v827_v21, %v575_v41 }
 0x355   :  { %v577_v19 = vmin.f32 %v576_v42, 20.0 }
 0x357   :  { %v578_v43 = vmul.f32 1.442695, %v577_v19 }
 0x359   :  { %697 = vpow2.f32 %v578_v43 }
 0x35f   :  { %v698_v44 = vpop.eup %697 }
 0x360   :  { %v580_v45 = vadd.f32 2.0, %v698_v44 }
 0x362   :  { %v581_v46 = vmul.f32 %v698_v44, %v580_v45 }
 0x364   :  { %v582_v47 = vadd.f32 2.0, %v581_v46 }
 0x366   :  { %699 = vrcp.f32 %v582_v47  ;;  %v594_v50 = vand.u32 2147483648, %v582_v47  ;;  %v592_v52 = vand.u32 2147483647, %v582_v47  ;;  %vm588_vm12 = vweird.f32 %v582_v47 }
 0x368   :  { %v595_v54 = vor.u32 1.1754944e-38, %v594_v50  ;;  %vm593_vm14 = vcmp.eq.f32.partialorder %v592_v52, 8.507059e+37 }
 0x36c   :  { %v700_v14 = vpop.eup %699 }
 0x36d   :  { %v584_v48 = vmul.f32 %v700_v14, %v582_v47  ;;  %vm589_vm2 = vweird.f32 %v700_v14 }
 0x36e   :  { %vm590_vm13 = vmor %vm588_vm12, %vm589_vm2 }
 0x36f   :  { %v585_v49 = vsub.f32 1.0, %v584_v48 }
 0x371   :  { %v586_v51 = vmul.f32 %v700_v14, %v585_v49 }
 0x373   :  { %v587_v53 = vadd.f32 %v700_v14, %v586_v51 }
 0x375   :  { %v591_v21 = vsel %vm590_vm13, %v700_v14, %v587_v53 }
 0x376   :  { %v596_v55 = vsel %vm593_vm14, %v595_v54, %v591_v21 }
 0x377   :  { %v597_v56 = vmul.f32 %v596_v55, %v581_v46 }
 0x379   :  { %v598_v57 = vmul.f32 %v597_v56, %v576_v42 }
 0x37b   :  { %600 = vst.msk [vmem:[#allocation2 + $0x4] sm:$0xf] %vm322_vm11, %v598_v57 }
 0x37c   :  { %613 = dma.vmem_to_hbm [thread:$0]  %s606_s25, 128, %s608_s28, [#allocation3], %s731_s29, %s731_s29, %s732_s30  }
 0x37d   :  { %725 = dma.done.wait [#allocation3], 128  }
 0x37e   :  { %726 = vsyncadd [#allocation3], 4294967168 }
 0x37f   :  { %618 = vsyncpa [#allocation3], 1 }

</bundles_post_ra>
